<compile_context>
chip_gen: v7x
topology: tpu7x:2x2x1
jax: 0.10.0
libtpu: 0.0.40
codegen_flags: <defaults>
</compile_context>

<pallas_src>
import jax
import jax.numpy as jnp
from jax.experimental import pallas as pl
from jax.experimental.pallas import tpu as pltpu


def _awl_kernel(p_ref, l_ref, out_ref, grads_ref):
    # p_ref / l_ref: (1, num) f32 in VMEM (full-array blocks, no padding, so
    # no lane mask is needed and there is no div-by-zero from padded lanes).
    p = p_ref[...]
    l = l_ref[...]

    p2 = p * p
    inv_p2 = 1.0 / p2            # exact divide: keeps the 1e-5 tolerance
    half_inv_p2 = 0.5 * inv_p2   # == dL/dl_i, reused below

    term = half_inv_p2 * l + jnp.log1p(p2)

    # Scalar result straight to SMEM (XLU reduce, no masked partial vst).
    out_ref[0] = jnp.sum(term)

    # Unit gradients emitted from otherwise-idle VPU/EUP slots; the custom_vjp
    # backward is then just `g * grads` with zero recompute.
    dp = -l * inv_p2 / p + 2.0 * p / (1.0 + p2)   # dL/dp_i = -l/p^3 + 2p/(1+p^2)
    grads_ref[0:1, :] = dp
    grads_ref[1:2, :] = half_inv_p2               # dL/dl_i = 0.5/p^2


def _awl_forward(params, losses):
    """params: (num,) f32, losses: (num,) f32 -> (scalar loss, (2, num) unit grads)."""
    num = params.shape[0]
    assert losses.shape[0] == num, "params and losses must have the same length"

    # Free reshapes only -- no pad/stack packing glue.
    p2d = params.astype(jnp.float32).reshape(1, num)
    l2d = losses.astype(jnp.float32).reshape(1, num)

    out, grads = pl.pallas_call(
        _awl_kernel,
        out_shape=(
            jax.ShapeDtypeStruct((1,), jnp.float32),        # scalar loss (SMEM)
            jax.ShapeDtypeStruct((2, num), jnp.float32),    # row 0: dL/dp, row 1: dL/dl
        ),
        in_specs=[
            pl.BlockSpec((1, num), lambda: (0, 0)),
            pl.BlockSpec((1, num), lambda: (0, 0)),
        ],
        out_specs=(
            pl.BlockSpec(memory_space=pltpu.SMEM),
            pl.BlockSpec((2, num), lambda: (0, 0)),
        ),
    )(p2d, l2d)
    return out[0], grads


@jax.custom_vjp
def automatic_weighted_loss(params, losses):
    out, _ = _awl_forward(params, losses)
    return out


def _awl_fwd(params, losses):
    out, grads = _awl_forward(params, losses)
    return out, grads  # unit gradients are the residuals


def _awl_bwd(grads, g):
    # grads: (2, num) f32 produced by the forward kernel.
    d_params = g * grads[0]   # (num,)
    d_losses = g * grads[1]   # (num,)
    return d_params, d_losses


automatic_weighted_loss.defvjp(_awl_fwd, _awl_bwd)


def reference(params, losses):
    p2 = params.astype(jnp.float32) ** 2
    return jnp.sum(0.5 / p2 * losses.astype(jnp.float32) + jnp.log1p(p2))


if __name__ == "__main__":
    num = 2
    ini = 0.5
    # Deterministic parameter init matching the module's __init__:
    # params = ones(num); params[0] *= ini; params[1] *= ini
    params = jnp.ones((num,), jnp.float32)
    params = params.at[0].set(params[0] * ini)
    params = params.at[1].set(params[1] * ini)

    # Example multi-task losses (scalars), deterministic.
    key = jax.random.PRNGKey(0)
    losses = jax.random.uniform(key, (num,), jnp.float32, minval=0.5, maxval=2.0)

    # Forward check against the pure-JAX reference.
    out = automatic_weighted_loss(params, losses)
    out = jax.block_until_ready(out)
    ref = reference(params, losses)
    assert jnp.allclose(out, ref, rtol=1e-5, atol=1e-5), (out, ref)

    # Gradient check (kernel-emitted residual gradients vs autodiff of reference).
    gk_p, gk_l = jax.grad(automatic_weighted_loss, argnums=(0, 1))(params, losses)
    gr_p, gr_l = jax.grad(reference, argnums=(0, 1))(params, losses)
    gk_p = jax.block_until_ready(gk_p)
    assert jnp.allclose(gk_p, gr_p, rtol=1e-5, atol=1e-5), (gk_p, gr_p)
    assert jnp.allclose(gk_l, gr_l, rtol=1e-5, atol=1e-5), (gk_l, gr_l)

    print("KERNEL_OK")
</pallas_src>

<mosaic_0001>
module attributes {stable_mosaic.version = 11 : i64} {
  func.func @_awl_kernel(%arg0: memref<1x2xf32, #tpu.memory_space<vmem>>, %arg1: memref<1x2xf32, #tpu.memory_space<vmem>>, %arg2: memref<1xf32, #tpu.memory_space<smem>>, %arg3: memref<2x2xf32, #tpu.memory_space<vmem>>) attributes {dimension_semantics = [], scalar_prefetch = 0 : i64, scratch_operands = 0 : i64, tpu.core_type = #tpu.core_type<tc>} {
    %c0 = arith.constant 0 : index
    %c0_0 = arith.constant 0 : index
    %0 = vector.load %arg0[%c0, %c0_0] : memref<1x2xf32, #tpu.memory_space<vmem>>, vector<1x2xf32>
    %c0_1 = arith.constant 0 : index
    %c0_2 = arith.constant 0 : index
    %1 = vector.load %arg1[%c0_1, %c0_2] : memref<1x2xf32, #tpu.memory_space<vmem>>, vector<1x2xf32>
    %2 = arith.mulf %0, %0 : vector<1x2xf32>
    %cst = arith.constant 1.000000e+00 : f32
    %3 = vector.broadcast %cst : f32 to vector<1x2xf32>
    %4 = arith.divf %3, %2 : vector<1x2xf32>
    %cst_3 = arith.constant 5.000000e-01 : f32
    %5 = vector.broadcast %cst_3 : f32 to vector<1x2xf32>
    %6 = arith.mulf %5, %4 : vector<1x2xf32>
    %7 = arith.mulf %6, %1 : vector<1x2xf32>
    %8 = math.log1p %2 : vector<1x2xf32>
    %9 = arith.addf %7, %8 : vector<1x2xf32>
    %10 = vector.shape_cast %9 : vector<1x2xf32> to vector<1x1x2xf32>
    %cst_4 = arith.constant dense<0.000000e+00> : vector<1xf32>
    %11 = vector.multi_reduction <add>, %10, %cst_4 [1, 2] : vector<1x1x2xf32> to vector<1xf32>
    %12 = vector.shape_cast %11 : vector<1xf32> to vector<1x1x1xf32>
    %13 = vector.extract %12[0, 0, 0] : f32 from vector<1x1x1xf32>
    %c0_5 = arith.constant 0 : index
    %14 = memref.load %arg2[%c0_5] : memref<1xf32, #tpu.memory_space<smem>>
    memref.store %13, %arg2[%c0_5] : memref<1xf32, #tpu.memory_space<smem>>
    %cst_6 = arith.constant 0.000000e+00 : f32
    %15 = vector.broadcast %cst_6 : f32 to vector<1x2xf32>
    %16 = arith.subf %15, %1 : vector<1x2xf32>
    %17 = arith.mulf %16, %4 : vector<1x2xf32>
    %18 = arith.divf %17, %0 : vector<1x2xf32>
    %cst_7 = arith.constant 2.000000e+00 : f32
    %19 = vector.broadcast %cst_7 : f32 to vector<1x2xf32>
    %20 = arith.mulf %19, %0 : vector<1x2xf32>
    %cst_8 = arith.constant 1.000000e+00 : f32
    %21 = vector.broadcast %cst_8 : f32 to vector<1x2xf32>
    %22 = arith.addf %21, %2 : vector<1x2xf32>
    %23 = arith.divf %20, %22 : vector<1x2xf32>
    %24 = arith.addf %18, %23 : vector<1x2xf32>
    %c0_9 = arith.constant 0 : index
    %c0_10 = arith.constant 0 : index
    %25 = vector.load %arg3[%c0_9, %c0_10] : memref<2x2xf32, #tpu.memory_space<vmem>>, vector<1x2xf32>
    tpu.vector_store %arg3[%c0_9, %c0_10], %24 {strides = array<i32>} : memref<2x2xf32, #tpu.memory_space<vmem>>, vector<1x2xf32>,
    %c1 = arith.constant 1 : index
    %c0_11 = arith.constant 0 : index
    %26 = vector.load %arg3[%c1, %c0_11] : memref<2x2xf32, #tpu.memory_space<vmem>>, vector<1x2xf32>
    tpu.vector_store %arg3[%c1, %c0_11], %6 {strides = array<i32>} : memref<2x2xf32, #tpu.memory_space<vmem>>, vector<1x2xf32>,
    return
  }
}

</mosaic_0001>

<bundles_post_ra>
// kernel: tpu_custom_call.1
= control target key start
LH: loop header
LB: loop body
LE: loop exit
PB: predicated region body
PF: predicated region fallthrough
CT: control target
= control target key end

     0   :  { %9 = vsyncpa [#allocation3], 0  ;;  %s234_s0 = inlined_call_operand.hbm [shape: f32[1,2], index: 0, kind: input, shape index: {}]   ;;  %s235_s1 = inlined_call_operand.vmem [shape: f32[1,2], index: 1, kind: input, shape index: {}]   ;;  %s236_s2 = inlined_call_operand.hbm [shape: f32[1], index: 2, kind: output, shape index: {0}]   ;;  %s237_s3 = inlined_call_operand.hbm [shape: f32[2,2], index: 3, kind: output, shape index: {1}]  }
   0x1   :  { %10 = vsyncpa [#allocation5], 0 }
   0x2   :  { %11 = vsyncpa [#allocation4], 0  ;;  %s169_s12 = smov [#allocation2]   ;;  %s109_s16 = scalar_lea.hbm %s234_s0, 16 }
   0x3   :  { %s18_s13 = sshll.u32 %s169_s12, 4  ;;  %p110_p0 = scmp.ne.s32.totalorder %s234_s0, %s109_s16  ;;  %s19_s13 = int_to_ptr.vmem [resolvable:$true] %s18_s13 }
   0x4   :  { %p113_p1 = scmp.lt.u32.totalorder %s109_s16, %s234_s0 }
   0x6   :  { %p115_p2 = pnand %p113_p1, %p110_p0 }
   0x8   :  { %118 = shalt.err (!%p115_p2)
}
   0x9   :  { %s119_s21 = scalar_lea.vmem %s19_s13, 16  ;;  %s123_s22 = scalar_lea.vmem %s19_s13, 32 }
   0xa   :  { %p120_p3 = scmp.ne.s32.totalorder %s19_s13, %s119_s21  ;;  %p124_p4 = scmp.lt.s32.totalorder %s19_s13, %s19_s13 }
   0xb   :  { %p125_p5 = scmp.lt.s32.totalorder %s123_s22, %s119_s21 }
   0xd   :  { %p126_p6 = por %p125_p5, %p124_p4 }
   0xf   :  { %p127_p7 = pnand %p126_p6, %p120_p3 }
  0x11   :  { %130 = shalt.err (!%p127_p7)
}
  0x12   :  { %21 = dma.hbm_to_vmem [thread:$0]  %s234_s0, 16, %s19_s13, [#allocation3]  }
  0x13   :  { %163 = dma.done.wait [#allocation3], 16  }
  0x14   :  { %164 = vsyncadd [#allocation3], 4294967280  ;;  %v27_v0 = vld [vmem:[#allocation2] sm:$0x1]  ;;  %vm44_vm1 = vcmask 8192   ;;  %s170_s0 = smov [#allocation7]  }
  0x15   :  { %v29_v1 = vmul.f32 %v27_v0, %v27_v0  ;;  %v28_v4 = vld [vmem:[%s235_s1] sm:$0x1]  ;;  %v61_v21 = vmul.f32 2.0, %v27_v0  ;;  %s82_s1 = sshll.u32 %s170_s0, 4  ;;  %s83_s1 = int_to_ptr.vmem [resolvable:$true] %s82_s1 }
  0x16   :  { %v57_v6 = vsub.f32 0.0, %v28_v4  ;;  %s131_s27 = scalar_lea.vmem %s83_s1, 32  ;;  %p136_p9 = scmp.lt.s32.totalorder %s83_s1, %s83_s1 }
  0x17   :  { %101 = vrcp.f32 %v29_v1  ;;  %v34_v2 = vadd.f32 1.0, %v29_v1  ;;  %v37_v3 = vmul.f32 -0.5, %v29_v1  ;;  %v40_v7 = vand.u32 2147483647, %v29_v1  ;;  %p132_p8 = scmp.ne.s32.totalorder %s83_s1, %s131_s27  ;;  %p137_p10 = scmp.lt.s32.totalorder %s131_s27, %s131_s27 }
  0x19   :  { %103 = vlog2.f32 %v34_v2  ;;  %v38_v5 = vadd.f32 1.0, %v37_v3  ;;  %vm41_vm0 = vcmp.lt.f32.partialorder %v40_v7, 0.0004427343  ;;  %p138_p11 = por %p137_p10, %p136_p9 }
  0x1a   :  { %105 = vrcp.f32 %v27_v0 }
  0x1b   :  { %v39_v10 = vmul.f32 %v38_v5, %v29_v1  ;;  %107 = vrcp.f32 %v34_v2  ;;  %p139_p12 = pnand %p138_p11, %p132_p8 }
  0x21   :  { %v102_v8 = vpop.eup %101 }
  0x22   :  { %v32_v9 = vmul.f32 0.5, %v102_v8  ;;  %v58_v11 = vmul.f32 %v102_v8, %v57_v6 }
  0x23   :  { %v104_v12 = vpop.eup %103 }
  0x24   :  { %v33_v13 = vmul.f32 %v32_v9, %v28_v4  ;;  %v36_v14 = vmul.f32 0.6931472, %v104_v12  ;;  %67 = vst.msk [vmem:[#allocation7 + $0x1] sm:$0x1] %vm44_vm1, %v32_v9  ;;  %v106_v18 = vpop.eup %105 }
  0x25   :  { %v108_v19 = vpop.eup %107  ;;  %v60_v20 = vmul.f32 %v106_v18, %v58_v11 }
  0x26   :  { %v42_v15 = vsel %vm41_vm0, %v39_v10, %v36_v14  ;;  %v64_v22 = vmul.f32 %v108_v19, %v61_v21 }
  0x27   :  { %v43_v16 = vadd.f32 %v42_v15, %v33_v13 }
  0x28   :  { %v65_v23 = vadd.f32 %v64_v22, %v60_v20 }
  0x29   :  { %v45_v17 = vsel %vm44_vm1, %v43_v16, 0.0 }
  0x2a   :  { %46 = vadd.xlane.f32.xlu0 %v45_v17  ;;  %66 = vst.msk [vmem:[#allocation7] sm:$0x1] %vm44_vm1, %v65_v23 }
  0x2b   :  { %142 = shalt.err (!%p139_p12)
}
  0x2c   :  { %s143_s30 = scalar_lea.hbm %s237_s3, 32 }
  0x2d   :  { %p144_p13 = scmp.ne.s32.totalorder %s237_s3, %s143_s30  ;;  %p147_p0 = scmp.lt.u32.totalorder %s143_s30, %s237_s3 }
  0x2f   :  { %p149_p1 = pnand %p147_p0, %p144_p13 }
  0x31   :  { %152 = shalt.err (!%p149_p1)
}
  0x32   :  { %85 = dma.vmem_to_hbm [thread:$0]  %s83_s1, 32, %s237_s3, [#allocation4]  }
  0x33   :  { %s153_s13 = scalar_lea.hbm %s236_s2, 16 }
  0x34   :  { %p154_p2 = scmp.ne.s32.totalorder %s236_s2, %s153_s13  ;;  %p157_p3 = scmp.lt.u32.totalorder %s153_s13, %s236_s2 }
  0x36   :  { %p159_p4 = pnand %p157_p3, %p154_p2 }
  0xb7   :  { %v47_v24 = vpop.xlane.xlu0 %46 }
  0xb8   :  { %v48_v25 = vrot.slane %v47_v24, 4 }
  0xba   :  { %v49_v26 = vadd.f32 %v48_v25, %v47_v24 }
  0xbc   :  { %v50_v27 = vrot.slane %v49_v26, 2 }
  0xbe   :  { %v51_v28 = vadd.f32 %v50_v27, %v49_v26 }
  0xc0   :  { %v52_v29 = vrot.slane %v51_v28, 1 }
  0xc2   :  { %v53_v30 = vadd.f32 %v52_v29, %v51_v28 }
  0xc4   :  { %96 = vpush %v53_v30 }
  0xf5   :  { %s97_s10 = spop %96 }
  0xf6   :  { %56 = sst [smem:[#allocation6]] %s97_s10 }
  0xf7   :  { %162 = shalt.err (!%p159_p4)
}
  0xf8   :  { %s171_s17 = smov [#allocation6]  }
  0xf9   :  { %75 = dma.smem_to_hbm %s171_s17, 16, %s236_s2, [#allocation5]  }
  0xfa   :  { %165 = dma.done.wait [#allocation5], 16  }
  0xfb   :  { %166 = vsyncadd [#allocation5], 4294967280 }
  0xfc   :  { %167 = dma.done.wait [#allocation4], 32  }
  0xfd   :  { %168 = vsyncadd [#allocation4], 4294967264 }
  0xfe   :  { %92 = sfence }
  0xff   :  { %93 = vsyncpa [#allocation3], 1 }
 0x100   :  { %94 = vsyncpa [#allocation4], 1 }
 0x101   :  { %95 = vsyncpa [#allocation5], 1 }

</bundles_post_ra>
